<compile_context>
chip_gen: v5e
topology: v5e:2x2
jax: 0.10.0
libtpu: 0.0.40
codegen_flags: <defaults>
</compile_context>

<pallas_src>
import functools

import jax
import jax.numpy as jnp
from jax.experimental import pallas as pl
from jax.experimental.pallas import tpu as pltpu


# ----------------------------------------------------------------------------
# Single increment: self.cont += 1
# ----------------------------------------------------------------------------
def _increment_kernel(cont_ref, out_ref):
    out_ref[0] = cont_ref[0] + 1


_increment_call = jax.jit(
    pl.pallas_call(
        _increment_kernel,
        out_shape=jax.ShapeDtypeStruct((1,), jnp.int32),
        in_specs=[pl.BlockSpec(memory_space=pltpu.SMEM)],
        out_specs=pl.BlockSpec(memory_space=pltpu.SMEM),
    )
)


# ----------------------------------------------------------------------------
# Batched increment: N forwards folded into ONE dispatch.
# Returns (new_counter (1,), sequence (n,)) so no follow-up slice op is needed.
# ----------------------------------------------------------------------------
def _increment_n_kernel(n, cont_ref, new_cont_ref, seq_ref):
    base = cont_ref[0]
    for i in range(n):            # small static unrolled scalar-unit writes
        seq_ref[i] = base + (i + 1)
    new_cont_ref[0] = base + n


@functools.lru_cache(maxsize=None)
def _increment_n_call(n):
    return jax.jit(
        pl.pallas_call(
            functools.partial(_increment_n_kernel, n),
            out_shape=(
                jax.ShapeDtypeStruct((1,), jnp.int32),
                jax.ShapeDtypeStruct((n,), jnp.int32),
            ),
            in_specs=[pl.BlockSpec(memory_space=pltpu.SMEM)],
            out_specs=(
                pl.BlockSpec(memory_space=pltpu.SMEM),
                pl.BlockSpec(memory_space=pltpu.SMEM),
            ),
        )
    )


class NetFirst:
    """JAX/Pallas mirror of the PyTorch NetFirst module.

    forward() is fully asynchronous: it updates and returns the on-device
    counter.  forward_n(n) amortizes launch overhead by doing n increments in
    one dispatch.  Materialize a Python int only via .value().
    """

    def __init__(self):
        # self.cont = 0 in the PyTorch module.
        # TODO(synk): int32 counter wraps after 2^31-1 increments; fine here.
        self.cont = jnp.zeros((1,), dtype=jnp.int32)

    def forward(self):
        # self.cont += 1; return self.cont   (single Pallas dispatch, no sync)
        self.cont = _increment_call(self.cont)
        return self.cont

    __call__ = forward

    def forward_n(self, n):
        # n consecutive forward() calls in ONE dispatch; returns the sequence
        # [cont+1, ..., cont+n] that the per-call loop would have produced.
        new_cont, seq = _increment_n_call(int(n))(self.cont)
        self.cont = new_cont
        return seq

    def value(self):
        # Explicit, synchronous materialization of the counter as a Python int.
        return int(jax.device_get(self.cont)[0])


if __name__ == "__main__":
    # forward() takes no tensor inputs; PRNGKey kept only for harness parity.
    _ = jax.random.PRNGKey(0)

    net = NetFirst()

    # Per-call path (matches the PyTorch call pattern exactly).
    outs = [net() for _ in range(3)]          # three async forward() calls
    jax.block_until_ready(net.cont)           # single sync
    results = [int(o[0]) for o in outs]
    assert results == [1, 2, 3], f"unexpected counter sequence: {results}"
    assert net.value() == 3

    # Batched path: 5 more increments in a single Pallas dispatch.
    seq = net.forward_n(5)
    jax.block_until_ready(seq)
    seq_list = [int(v) for v in jax.device_get(seq)]
    assert seq_list == [4, 5, 6, 7, 8], f"unexpected batched sequence: {seq_list}"
    assert net.value() == 8

    print("KERNEL_OK")
</pallas_src>

<mosaic_0001>
module attributes {stable_mosaic.version = 11 : i64} {
  func.func @_increment_kernel(%arg0: memref<1xi32, #tpu.memory_space<smem>>, %arg1: memref<1xi32, #tpu.memory_space<smem>>) attributes {dimension_semantics = [], scalar_prefetch = 0 : i64, scratch_operands = 0 : i64, tpu.core_type = #tpu.core_type<tc>} {
    %c0 = arith.constant 0 : index
    %0 = memref.load %arg0[%c0] : memref<1xi32, #tpu.memory_space<smem>>
    %c1_i32 = arith.constant 1 : i32
    %1 = arith.addi %0, %c1_i32 : i32
    %c0_0 = arith.constant 0 : index
    %2 = memref.load %arg1[%c0_0] : memref<1xi32, #tpu.memory_space<smem>>
    memref.store %1, %arg1[%c0_0] : memref<1xi32, #tpu.memory_space<smem>>
    return
  }
}

</mosaic_0001>

<bundles_post_ra>
// kernel: tpu_custom_call.1
= control target key start
LH: loop header
LB: loop body
LE: loop exit
PB: predicated region body
PF: predicated region fallthrough
CT: control target
= control target key end

     0   :  { %7 = vsyncpa [#allocation4], 0  ;;  %s44_s12 = smov [#allocation3]   ;;  %s61_s0 = inlined_call_operand.<no memory space> [shape: s32[1], index: 0, kind: input, shape index: {}]   ;;  %s62_s1 = inlined_call_operand.hbm [shape: s32[1], index: 1, kind: output, shape index: {}]  }
   0x1   :  { %s11_s8 = sadd.s32 1, %s61_s0  ;;  %s19_s11 = sshll.u32 %s62_s1, 4  ;;  %s20_s11 = int_to_ptr.hbm [resolvable:$true] %s19_s11 }
   0x2   :  { %13 = sst [smem:[#allocation3]] %s11_s8 }
   0x3   :  { %22 = dma.smem_to_hbm %s44_s12, 16, %s20_s11, [#allocation4]  }
   0x4   :  { %42 = dma.done.wait [#allocation4], 16  }
   0x5   :  { %43 = vsyncadd [#allocation4], 4294967280 }
   0x6   :  { %27 = sfence }
   0x7   :  { %28 = vsyncpa [#allocation4], 1 }

</bundles_post_ra>
